<compile_context>
chip_gen: v7x
topology: tpu7x:2x2x1
jax: 0.10.0
libtpu: 0.0.40
codegen_flags: <defaults>
</compile_context>

<pallas_src>
from functools import partial

import jax
import jax.numpy as jnp
from jax.experimental import pallas as pl
from jax.experimental.pallas import tpu as pltpu


# ---------------------------------------------------------------------------
# Kernels
# ---------------------------------------------------------------------------
def _mm_sigmoid_small_kernel(x_ref, w_ref, o_ref):
    # Whole problem fits in VMEM: one MXU matmul (f32 accumulation) + sigmoid
    # (exp lands on the EUP slot, essentially free next to the matmul).
    acc = jnp.dot(x_ref[...], w_ref[...], preferred_element_type=jnp.float32)
    o_ref[...] = jax.nn.sigmoid(acc).astype(o_ref.dtype)


def _mm_sigmoid_tiled_kernel(x_ref, w_ref, o_ref):
    # K-reduction accumulator pattern, accumulating directly into the resident
    # f32 output block (its block index is constant across k). Sigmoid only in
    # the finalize branch.
    k = pl.program_id(2)

    @pl.when(k == 0)
    def _():
        o_ref[...] = jnp.zeros_like(o_ref)

    o_ref[...] += jnp.dot(
        x_ref[...], w_ref[...], preferred_element_type=jnp.float32
    )

    @pl.when(k == pl.num_programs(2) - 1)
    def _():
        o_ref[...] = jax.nn.sigmoid(o_ref[...])


# ---------------------------------------------------------------------------
# Wrapper
# ---------------------------------------------------------------------------
def _round_up(x: int, m: int) -> int:
    return ((x + m - 1) // m) * m


# Max tile sizes (clamped per problem). bf16 operands, f32 output,
# double-buffered: x 2*tm*tk*2 + w 2*tk*tn*2 + out 2*tm*tn*4
# = ~6 MiB at (512,512,1024), ~10 MiB with the widened-TN skinny-M variant.
_TM_MAX, _TN_MAX, _TK_MAX = 512, 512, 1024
_VMEM_LIMIT = 48 * 1024 * 1024  # safe on v7x (64 MiB phys); plenty on v5e/v6e


def _padded_k(K: int) -> int:
    """Zero-padded K extent so the K grid axis always divides exactly."""
    Kp = _round_up(K, 128)
    if Kp <= _TK_MAX:
        return Kp
    return _round_up(Kp, _TK_MAX)


def _mm_sigmoid_padded(x_p: jax.Array, w_p: jax.Array) -> jax.Array:
    """sigmoid(x_p @ w_p). x_p:(M,Kp), w_p:(Kp,N); Kp already zero-padded."""
    M, Kp = x_p.shape
    Kp2, N = w_p.shape
    assert Kp == Kp2, f"inner dims mismatch: {Kp} vs {Kp2}"
    isz = x_p.dtype.itemsize

    # bf16 packs 16 rows per vreg sublane group; keep tm a multiple of 16.
    m_align = 16 if x_p.dtype == jnp.bfloat16 else 8
    tk = Kp if Kp <= _TK_MAX else _TK_MAX
    assert Kp % tk == 0
    tm = min(_TM_MAX, _round_up(M, m_align))
    tn = min(_TN_MAX, _round_up(N, 128))

    # Skinny-M shapes: one tile covers all of M, so widen TN (the (K,N) weight
    # stream dominates HBM traffic) while keeping >= 2 N-tiles so both v7x
    # TensorCores stay busy on the "parallel" N axis.
    if tm >= M and pl.cdiv(N, 2 * _TN_MAX) >= 2:
        tn = 2 * _TN_MAX

    gm, gn, gk = pl.cdiv(M, tm), pl.cdiv(N, tn), Kp // tk

    if gm == 1 and gn == 1 and gk == 1:
        cost = pl.CostEstimate(
            flops=2 * M * N * Kp,
            transcendentals=M * N,
            bytes_accessed=M * Kp * isz + Kp * N * isz + M * N * 4,
        )
        return pl.pallas_call(
            _mm_sigmoid_small_kernel,
            out_shape=jax.ShapeDtypeStruct((M, N), jnp.float32),
            in_specs=[
                pl.BlockSpec(memory_space=pltpu.MemorySpace.VMEM),
                pl.BlockSpec(memory_space=pltpu.MemorySpace.VMEM),
            ],
            out_specs=pl.BlockSpec(memory_space=pltpu.MemorySpace.VMEM),
            cost_estimate=cost,
        )(x_p, w_p)

    # Tiled path. Edge tiles on M/N are partial blocks (masked stores only);
    # K is fully zero-padded so every accumulated contribution is exact.
    cost = pl.CostEstimate(
        flops=2 * M * N * Kp,
        transcendentals=M * N,
        bytes_accessed=(M * Kp * isz * gn          # x re-read per N tile
                        + Kp * N * isz * gm        # w re-read per M tile
                        + M * N * 4),              # output written once
    )
    return pl.pallas_call(
        _mm_sigmoid_tiled_kernel,
        out_shape=jax.ShapeDtypeStruct((M, N), jnp.float32),
        grid_spec=pltpu.PrefetchScalarGridSpec(
            num_scalar_prefetch=0,
            grid=(gm, gn, gk),                     # reduction axis (K) last
            in_specs=[
                pl.BlockSpec((tm, tk), lambda i, j, k: (i, k)),
                pl.BlockSpec((tk, tn), lambda i, j, k: (k, j)),
            ],
            out_specs=pl.BlockSpec((tm, tn), lambda i, j, k: (i, j)),
        ),
        compiler_params=pltpu.CompilerParams(
            # M/N parallel -> shards across v7x's 2 TensorCores; K arbitrary.
            dimension_semantics=("parallel", "parallel", "arbitrary"),
            vmem_limit_bytes=_VMEM_LIMIT,
        ),
        cost_estimate=cost,
    )(x_p, w_p)


@partial(jax.jit, static_argnames=("use_bf16",))
def _forward(x: jax.Array, w_prepared: jax.Array, use_bf16: bool) -> jax.Array:
    """Pad x's K to match the prepared weight, cast, run the kernel."""
    K = x.shape[1]
    Kp = w_prepared.shape[0]
    if Kp != K:
        # Padded K columns multiply against padded (zero) weight rows -> exact.
        x = jnp.pad(x, ((0, 0), (0, Kp - K)))
    if use_bf16:
        x = x.astype(jnp.bfloat16)
    return _mm_sigmoid_padded(x, w_prepared)


class PallasMmSigmoid:
    """JAX/Pallas equivalent of TorchModel: forward(x) = sigmoid(x @ weight)."""

    def __init__(self, weight, use_bf16: bool = True):
        w = jnp.asarray(weight, dtype=jnp.float32)
        K, _ = w.shape
        self._K = K
        self._use_bf16 = use_bf16
        Kp = _padded_k(K)
        if Kp != K:
            w = jnp.pad(w, ((0, Kp - K), (0, 0)))   # zero rows -> exact matmul
        # Hoisted one-time prep: pad + (optional) bf16 cast of the parameter.
        self.weight = w.astype(jnp.bfloat16) if use_bf16 else w

    def __call__(self, x):
        return self.forward(x)

    def forward(self, x):
        x = jnp.asarray(x, dtype=jnp.float32)
        assert x.ndim == 2 and x.shape[1] == self._K, \
            f"expected x with K={self._K}, got {x.shape}"
        return _forward(x, self.weight, use_bf16=self._use_bf16)


# ---------------------------------------------------------------------------
# Demo / correctness check
# ---------------------------------------------------------------------------
if __name__ == "__main__":
    key = jax.random.PRNGKey(0)
    kx, kw, kx2, kw2 = jax.random.split(key, 4)

    # Small shapes matching TorchModel.forward (torch.mm: x:(M,K), weight:(K,N)).
    M, K, N = 8, 32, 16
    x = jax.random.normal(kx, (M, K), dtype=jnp.float32)
    weight = jax.random.normal(kw, (K, N), dtype=jnp.float32)

    # Default fast path: bf16 operands, f32 accumulation.
    model = PallasMmSigmoid(weight)
    out = model(x)
    jax.block_until_ready(out)
    assert out.shape == (M, N)

    ref_bf16 = jax.nn.sigmoid(
        jnp.dot(x.astype(jnp.bfloat16), weight.astype(jnp.bfloat16),
                preferred_element_type=jnp.float32))
    ref_f32 = jax.nn.sigmoid(
        jnp.dot(x, weight, precision=jax.lax.Precision.HIGHEST))
    assert jnp.allclose(out, ref_bf16, atol=1e-4, rtol=1e-4), "bf16-path mismatch"
    assert jnp.allclose(out, ref_f32, atol=3e-2), "bf16 path too far from f32 ref"

    # Exact-f32 operand path matches the f32 torch reference closely.
    model_f32 = PallasMmSigmoid(weight, use_bf16=False)
    out_f32 = model_f32(x)
    jax.block_until_ready(out_f32)
    assert jnp.allclose(out_f32, ref_f32, atol=1e-4, rtol=1e-4), "f32-path mismatch"

    # Exercise the tiled (grid) path once: non-aligned shapes -> partial edge
    # tiles on M and N (masked stores), zero-padded K, grid (2, 2, 2).
    M2, K2, N2 = 600, 1100, 700
    x2 = jax.random.normal(kx2, (M2, K2), dtype=jnp.float32)
    w2 = jax.random.normal(kw2, (K2, N2), dtype=jnp.float32)
    model2 = PallasMmSigmoid(w2)
    out2 = model2(x2)
    jax.block_until_ready(out2)
    assert out2.shape == (M2, N2)
    ref2_bf16 = jax.nn.sigmoid(
        jnp.dot(x2.astype(jnp.bfloat16), w2.astype(jnp.bfloat16),
                preferred_element_type=jnp.float32))
    assert jnp.allclose(out2, ref2_bf16, atol=2e-3, rtol=2e-3), "tiled-path mismatch"

    print("KERNEL_OK")
</pallas_src>

<mosaic_0001>
module attributes {stable_mosaic.version = 11 : i64} {
  func.func @_mm_sigmoid_small_kernel(%arg0: memref<8x128xbf16, #tpu.memory_space<vmem>>, %arg1: memref<128x16xbf16, #tpu.memory_space<vmem>>, %arg2: memref<8x16xf32, #tpu.memory_space<vmem>>) attributes {dimension_semantics = [], scalar_prefetch = 0 : i64, scratch_operands = 0 : i64, tpu.core_type = #tpu.core_type<tc>} {
    %c0 = arith.constant 0 : index
    %c0_0 = arith.constant 0 : index
    %0 = vector.load %arg0[%c0, %c0_0] : memref<8x128xbf16, #tpu.memory_space<vmem>>, vector<8x128xbf16>
    %c0_1 = arith.constant 0 : index
    %c0_2 = arith.constant 0 : index
    %1 = vector.load %arg1[%c0_1, %c0_2] : memref<128x16xbf16, #tpu.memory_space<vmem>>, vector<128x16xbf16>
    %cst = arith.constant dense<0.000000e+00> : vector<8x16xf32>
    %2 = tpu.matmul %0, %1, %cst {dimension_numbers = #tpu.dot_dimension_numbers<[1], [0], [0], [1], [0, 0, 1, 1], [], []>} : vector<8x128xbf16>, vector<128x16xbf16>, vector<8x16xf32> -> vector<8x16xf32>
    %3 = arith.negf %2 : vector<8x16xf32>
    %4 = math.exp %3 : vector<8x16xf32>
    %cst_3 = arith.constant 1.000000e+00 : f32
    %5 = vector.broadcast %cst_3 : f32 to vector<8x16xf32>
    %6 = arith.addf %5, %4 : vector<8x16xf32>
    %7 = arith.divf %5, %6 : vector<8x16xf32>
    %c0_4 = arith.constant 0 : index
    %c0_5 = arith.constant 0 : index
    %8 = vector.load %arg2[%c0_4, %c0_5] : memref<8x16xf32, #tpu.memory_space<vmem>>, vector<8x16xf32>
    tpu.vector_store %arg2[%c0_4, %c0_5], %7 {strides = array<i32>} : memref<8x16xf32, #tpu.memory_space<vmem>>, vector<8x16xf32>,
    return
  }
}

</mosaic_0001>

<bundles_post_ra>
// kernel: _forward.1
= control target key start
LH: loop header
LB: loop body
LE: loop exit
PB: predicated region body
PF: predicated region fallthrough
CT: control target
= control target key end

     0   :  { %v217_v1 = vmov 0.0   ;;  %vm218_vm0 = vmmov 0   ;;  %s274_s0 = inlined_call_operand.vmem [shape: bf16[8,128], index: 0, kind: input, shape index: {}]   ;;  %s275_s1 = inlined_call_operand.vmem [shape: bf16[128,16], index: 1, kind: input, shape index: {}]   ;;  %s276_s2 = inlined_call_operand.hbm [shape: f32[8,16], index: 2, kind: output, shape index: {}]  }
   0x1   :  { %v181_v0 = vld [vmem:[%s275_s1] sm:$0xff]   ;;  %158 = vmatprep.subr.bf16.mxu0 %v217_v1  ;;  %v182_v2 = vld [vmem:[%s275_s1 + $0x8] sm:$0xff]   ;;  %174 = vmatprep.mubr.msk.bf16.mxu0 %vm218_vm0, %v217_v1  ;;  %v183_v3 = vld [vmem:[%s275_s1 + $0x10] sm:$0xff]  }
   0x2   :  { %159 = vmatpush3.bf16.msra.mxu0 %v181_v0 }
   0x3   :  { %160 = vmatprep.subr.bf16.mxu0 %v217_v1 }
   0x6   :  { %161 = vmatpush3.bf16.msra.mxu0 %v182_v2 }
   0x7   :  { %162 = vmatprep.subr.bf16.mxu0 %v217_v1 }
   0x8   :  { %7 = vsyncpa [#allocation3], 0  ;;  %v184_v4 = vld [vmem:[%s275_s1 + $0x18] sm:$0xff]   ;;  %v185_v5 = vld [vmem:[%s275_s1 + $0x20] sm:$0xff]   ;;  %s219_s27 = smov [#allocation2]   ;;  %vm124_vm1 = vcmask 130048  }
   0x9   :  { %v186_v6 = vld [vmem:[%s275_s1 + $0x28] sm:$0xff]   ;;  %v187_v7 = vld [vmem:[%s275_s1 + $0x30] sm:$0xff]   ;;  %v188_v8 = vld [vmem:[%s275_s1 + $0x38] sm:$0xff]   ;;  %s132_s28 = sshll.u32 %s219_s27, 4  ;;  %s133_s28 = int_to_ptr.vmem [resolvable:$true] %s132_s28 }
   0xa   :  { %163 = vmatpush3.bf16.msra.mxu0 %v183_v3  ;;  %v13_v9 = vld [vmem:[%s274_s0] sm:$0xf]  ;;  %s193_s1 = scalar_lea.vmem %s133_s28, 128  ;;  %p198_p1 = scmp.lt.s32.totalorder %s133_s28, %s133_s28 }
   0xb   :  { %164 = vmatprep.subr.bf16.mxu0 %v217_v1  ;;  %p194_p0 = scmp.ne.s32.totalorder %s133_s28, %s193_s1  ;;  %p199_p2 = scmp.lt.s32.totalorder %s193_s1, %s193_s1 }
   0xd   :  { %p200_p3 = por %p199_p2, %p198_p1 }
   0xe   :  { %165 = vmatpush3.bf16.msra.mxu0 %v184_v4 }
   0xf   :  { %166 = vmatprep.subr.bf16.mxu0 %v217_v1  ;;  %p201_p4 = pnand %p200_p3, %p194_p0 }
  0x12   :  { %167 = vmatpush3.bf16.msra.mxu0 %v185_v5 }
  0x13   :  { %168 = vmatprep.subr.bf16.mxu0 %v217_v1 }
  0x16   :  { %169 = vmatpush3.bf16.msra.mxu0 %v186_v6 }
  0x17   :  { %170 = vmatprep.subr.bf16.mxu0 %v217_v1 }
  0x1a   :  { %171 = vmatpush3.bf16.msra.mxu0 %v187_v7 }
  0x1b   :  { %172 = vmatprep.subr.bf16.mxu0 %v217_v1 }
  0x1e   :  { %173 = vmatpush3.bf16.msra.mxu0 %v188_v8 }
  0x21   :  { %175 = vmatmul.mubr.bf16.vlgmr.msra.gmra.mrb[0].mxu0 %v13_v9 }
  0xf4   :  { %v112_v10 = vpop.f32.mrb[0].mxu0 }
  0xf5   :  { %v148_v11 = vmul.f32 -1.442695, %v112_v10  ;;  %v176_v12 = vpop.f32.mrb[1].mxu0 }
  0xf6   :  { %v115_v13 = vpop.f32.mrb[2].mxu0 }
  0xf7   :  { %189 = vpow2.f32 %v148_v11  ;;  %v177_v14 = vpop.f32.mrb[3].mxu0 }
 0x101   :  { %v190_v15 = vpop.eup %189 }
 0x102   :  { %v121_v16 = vadd.f32 1.0, %v190_v15 }
 0x104   :  { %191 = vrcp.f32 %v121_v16 }
 0x10e   :  { %v192_v17 = vpop.eup %191 }
 0x10f   :  { %125 = vst.msk [vmem:[#allocation2] sm:$0xff] %vm124_vm1, %v192_v17 }
 0x110   :  { %204 = shalt.err (!%p201_p4)
}
 0x111   :  { %s205_s30 = scalar_lea.hbm %s276_s2, 128 }
 0x112   :  { %p206_p5 = scmp.ne.s32.totalorder %s276_s2, %s205_s30  ;;  %p209_p6 = scmp.lt.u32.totalorder %s205_s30, %s276_s2 }
 0x114   :  { %p211_p7 = pnand %p209_p6, %p206_p5 }
 0x116   :  { %214 = shalt.err (!%p211_p7)
}
 0x117   :  { %135 = dma.vmem_to_hbm [thread:$0]  %s133_s28, 128, %s276_s2, [#allocation3]  }
 0x118   :  { %215 = dma.done.wait [#allocation3], 128  }
 0x119   :  { %216 = vsyncadd [#allocation3], 4294967168 }
 0x11a   :  { %139 = vsyncpa [#allocation3], 1 }

</bundles_post_ra>
